<compile_context>
chip_gen: v7x
topology: tpu7x:2x2x1
jax: 0.10.0
libtpu: 0.0.40
codegen_flags: <defaults>
</compile_context>

<pallas_src>
import functools

import jax
import jax.numpy as jnp
from jax.experimental import pallas as pl
from jax.experimental.pallas import tpu as pltpu


def _rnn_fused_kernel(x_ref, wih_t_ref, whh_t_ref, brnn_ref, wfc_ref, bfc_ref,
                      out_ref, *, batch, seq):
    """Single-invocation kernel (no grid).

    x_ref     : (B*S, D)  flat batch-major inputs (x.reshape(B*S, D))
    wih_t_ref : (D, H)    input->hidden weight, transposed
    whh_t_ref : (H, H)    hidden->hidden weight, transposed
    brnn_ref  : (1, H)    b_ih + b_hh (folded once)
    wfc_ref   : (1, H)    fc weight row (output_dim == 1)
    bfc_ref   : (1,)      fc bias, SMEM scalar
    out_ref   : (B, 1)    sigmoid(fc(h_last))
    """
    H = whh_t_ref.shape[0]
    hp = jax.lax.Precision.HIGHEST

    # ---- Fused input projection (no serial dependency -> off the loop) ----
    # One MXU matmul covering ALL timesteps, both RNN biases folded in.
    u = jnp.dot(x_ref[...], wih_t_ref[...],
                preferred_element_type=jnp.float32, precision=hp)   # (B*S, H)
    u = (u + brnn_ref[...]).reshape(batch, seq, H)                   # (B, S, H)

    whh_t = whh_t_ref[...]          # load once; resident across the recurrence

    # ---- Serial recurrence: h_t = tanh(u_t + h_{t-1} @ W_hh^T) ------------
    # seq is small and static -> fully static unroll; u[:, t, :] is a static
    # slice, so the only per-step work on the critical path is one tiny MXU
    # matmul and a tanh.
    h = jnp.zeros((batch, H), jnp.float32)
    for t in range(seq):
        hh = jnp.dot(h, whh_t, preferred_element_type=jnp.float32, precision=hp)
        h = jnp.tanh(u[:, t, :] + hh)

    # ---- fc with output_dim == 1: VPU multiply + lane reduction + sigmoid --
    # (avoids a 1-column, 99%-padded MXU matmul). Bias is a scalar from SMEM.
    logits = jnp.sum(h * wfc_ref[...], axis=-1, keepdims=True) + bfc_ref[0]
    out_ref[...] = jax.nn.sigmoid(logits)


def rnn_hamiltonian_net(x, w_ih, w_hh, b_ih, b_hh, w_fc, b_fc):
    """x: (batch, seq, input_dim) -- PyTorch batch_first layout.
    Returns sigmoid(fc(h_last)) with shape (batch, output_dim)."""
    B, S, D = x.shape
    H = w_ih.shape[0]
    O = w_fc.shape[0]
    assert O == 1, "module spec fixes output_dim = 1"

    # Wrapper-side preparation is limited to free / tiny ops:
    #   * (B,S,D) -> (B*S,D) reshape of x is a view (no HBM pass).
    #   * weight transposes are on tiny (H,D)/(H,H) constants.
    x2d = x.astype(jnp.float32).reshape(B * S, D)
    wih_t = w_ih.T.astype(jnp.float32)                     # (D, H)
    whh_t = w_hh.T.astype(jnp.float32)                     # (H, H)
    brnn = (b_ih + b_hh).astype(jnp.float32).reshape(1, H)  # (1, H)
    wfc_row = w_fc.astype(jnp.float32).reshape(1, H)        # (1, H)
    bfc = b_fc.astype(jnp.float32).reshape(1)               # (1,) scalar -> SMEM

    vmem = pltpu.MemorySpace.VMEM
    smem = pltpu.MemorySpace.SMEM

    kernel = functools.partial(_rnn_fused_kernel, batch=B, seq=S)

    # NOTE: everything fits trivially in VMEM at these shapes; if S/H grow,
    # chunk the time axis over a grid (hidden state in VMEM scratch, axis
    # marked "arbitrary") and set CompilerParams(vmem_limit_bytes=...) sized
    # for v7x's 64 MiB / v5e's 16 MiB scoped defaults.
    out = pl.pallas_call(
        kernel,
        out_shape=jax.ShapeDtypeStruct((B, O), jnp.float32),
        in_specs=[
            pl.BlockSpec(memory_space=vmem),   # x2d
            pl.BlockSpec(memory_space=vmem),   # W_ih^T
            pl.BlockSpec(memory_space=vmem),   # W_hh^T
            pl.BlockSpec(memory_space=vmem),   # b_ih + b_hh
            pl.BlockSpec(memory_space=vmem),   # fc weight row
            pl.BlockSpec(memory_space=smem),   # fc bias scalar
        ],
        out_specs=pl.BlockSpec(memory_space=vmem),
    )(x2d, wih_t, whh_t, brnn, wfc_row, bfc)
    return out


def _reference(x, w_ih, w_hh, b_ih, b_hh, w_fc, b_fc):
    B, S, D = x.shape
    H = w_ih.shape[0]
    hp = jax.lax.Precision.HIGHEST
    h = jnp.zeros((B, H), jnp.float32)
    for t in range(S):
        h = jnp.tanh(jnp.dot(x[:, t, :], w_ih.T, precision=hp) + b_ih
                     + jnp.dot(h, w_hh.T, precision=hp) + b_hh)
    return jax.nn.sigmoid(jnp.dot(h, w_fc.T, precision=hp) + b_fc)


if __name__ == "__main__":
    # Small synthetic shapes consistent with the module:
    #   input_dim = adjacency-matrix size (synthetic 32), hidden_dim = 16,
    #   output_dim = 1, batch = 2, seq = 8.
    B, S, D, H, O = 2, 8, 32, 16, 1

    key = jax.random.PRNGKey(0)
    k_x, k1, k2, k3, k4, k5, k6 = jax.random.split(key, 7)

    # Deterministic parameter init (PyTorch nn.RNN / nn.Linear style uniform).
    bound_rnn = 1.0 / jnp.sqrt(H)
    w_ih = jax.random.uniform(k1, (H, D), jnp.float32, -bound_rnn, bound_rnn)
    w_hh = jax.random.uniform(k2, (H, H), jnp.float32, -bound_rnn, bound_rnn)
    b_ih = jax.random.uniform(k3, (H,), jnp.float32, -bound_rnn, bound_rnn)
    b_hh = jax.random.uniform(k4, (H,), jnp.float32, -bound_rnn, bound_rnn)
    bound_fc = 1.0 / jnp.sqrt(H)
    w_fc = jax.random.uniform(k5, (O, H), jnp.float32, -bound_fc, bound_fc)
    b_fc = jax.random.uniform(k6, (O,), jnp.float32, -bound_fc, bound_fc)

    # Input: rows of a synthetic 0/1 adjacency-like matrix per timestep.
    # TODO(synk): original module reads the adjacency matrix from
    # 'II_7932.hcp.txt'; file I/O is replaced by this synthetic input.
    x = (jax.random.uniform(k_x, (B, S, D)) > 0.5).astype(jnp.float32)

    out = jax.block_until_ready(
        rnn_hamiltonian_net(x, w_ih, w_hh, b_ih, b_hh, w_fc, b_fc))

    ref = _reference(x, w_ih, w_hh, b_ih, b_hh, w_fc, b_fc)
    assert out.shape == (B, O)
    assert jnp.allclose(out, ref, atol=1e-5, rtol=1e-5), (out, ref)

    print("KERNEL_OK")
</pallas_src>

<mosaic_0001>
module attributes {stable_mosaic.version = 11 : i64} {
  func.func @_rnn_fused_kernel(%arg0: memref<16x32xf32, #tpu.memory_space<vmem>>, %arg1: memref<32x16xf32, #tpu.memory_space<vmem>>, %arg2: memref<16x16xf32, #tpu.memory_space<vmem>>, %arg3: memref<1x16xf32, #tpu.memory_space<vmem>>, %arg4: memref<1x16xf32, #tpu.memory_space<vmem>>, %arg5: memref<1xf32, #tpu.memory_space<smem>>, %arg6: memref<2x1xf32, #tpu.memory_space<vmem>>) attributes {dimension_semantics = [], scalar_prefetch = 0 : i64, scratch_operands = 0 : i64, tpu.core_type = #tpu.core_type<tc>} {
    %c0 = arith.constant 0 : index
    %c0_0 = arith.constant 0 : index
    %0 = vector.load %arg0[%c0, %c0_0] : memref<16x32xf32, #tpu.memory_space<vmem>>, vector<16x32xf32>
    %c0_1 = arith.constant 0 : index
    %c0_2 = arith.constant 0 : index
    %1 = vector.load %arg1[%c0_1, %c0_2] : memref<32x16xf32, #tpu.memory_space<vmem>>, vector<32x16xf32>
    %cst = arith.constant dense<0.000000e+00> : vector<16x16xf32>
    %2 = tpu.matmul %0, %1, %cst {dimension_numbers = #tpu.dot_dimension_numbers<[1], [0], [0], [1], [0, 0, 1, 1], [], []>, precision = #tpu.contract_precision<fp32>} : vector<16x32xf32>, vector<32x16xf32>, vector<16x16xf32> -> vector<16x16xf32>
    %c0_3 = arith.constant 0 : index
    %c0_4 = arith.constant 0 : index
    %3 = vector.load %arg3[%c0_3, %c0_4] : memref<1x16xf32, #tpu.memory_space<vmem>>, vector<1x16xf32>
    %4 = vector.broadcast %3 : vector<1x16xf32> to vector<16x16xf32>
    %5 = arith.addf %2, %4 : vector<16x16xf32>
    %6 = vector.shape_cast %5 : vector<16x16xf32> to vector<2x8x16xf32>
    %c0_5 = arith.constant 0 : index
    %c0_6 = arith.constant 0 : index
    %7 = vector.load %arg2[%c0_5, %c0_6] : memref<16x16xf32, #tpu.memory_space<vmem>>, vector<16x16xf32>
    %cst_7 = arith.constant 0.000000e+00 : f32
    %8 = vector.broadcast %cst_7 : f32 to vector<2x16xf32>
    %cst_8 = arith.constant dense<0.000000e+00> : vector<2x16xf32>
    %9 = tpu.matmul %8, %7, %cst_8 {dimension_numbers = #tpu.dot_dimension_numbers<[1], [0], [0], [1], [0, 0, 1, 1], [], []>, precision = #tpu.contract_precision<fp32>} : vector<2x16xf32>, vector<16x16xf32>, vector<2x16xf32> -> vector<2x16xf32>
    %10 = vector.extract_strided_slice %6 {offsets = [0, 0, 0], sizes = [2, 1, 16], strides = [1, 1, 1]} : vector<2x8x16xf32> to vector<2x1x16xf32>
    %11 = vector.shape_cast %10 : vector<2x1x16xf32> to vector<2x16xf32>
    %12 = arith.addf %11, %9 : vector<2x16xf32>
    %13 = math.tanh %12 : vector<2x16xf32>
    %cst_9 = arith.constant dense<0.000000e+00> : vector<2x16xf32>
    %14 = tpu.matmul %13, %7, %cst_9 {dimension_numbers = #tpu.dot_dimension_numbers<[1], [0], [0], [1], [0, 0, 1, 1], [], []>, precision = #tpu.contract_precision<fp32>} : vector<2x16xf32>, vector<16x16xf32>, vector<2x16xf32> -> vector<2x16xf32>
    %15 = vector.extract_strided_slice %6 {offsets = [0, 1, 0], sizes = [2, 1, 16], strides = [1, 1, 1]} : vector<2x8x16xf32> to vector<2x1x16xf32>
    %16 = vector.shape_cast %15 : vector<2x1x16xf32> to vector<2x16xf32>
    %17 = arith.addf %16, %14 : vector<2x16xf32>
    %18 = math.tanh %17 : vector<2x16xf32>
    %cst_10 = arith.constant dense<0.000000e+00> : vector<2x16xf32>
    %19 = tpu.matmul %18, %7, %cst_10 {dimension_numbers = #tpu.dot_dimension_numbers<[1], [0], [0], [1], [0, 0, 1, 1], [], []>, precision = #tpu.contract_precision<fp32>} : vector<2x16xf32>, vector<16x16xf32>, vector<2x16xf32> -> vector<2x16xf32>
    %20 = vector.extract_strided_slice %6 {offsets = [0, 2, 0], sizes = [2, 1, 16], strides = [1, 1, 1]} : vector<2x8x16xf32> to vector<2x1x16xf32>
    %21 = vector.shape_cast %20 : vector<2x1x16xf32> to vector<2x16xf32>
    %22 = arith.addf %21, %19 : vector<2x16xf32>
    %23 = math.tanh %22 : vector<2x16xf32>
    %cst_11 = arith.constant dense<0.000000e+00> : vector<2x16xf32>
    %24 = tpu.matmul %23, %7, %cst_11 {dimension_numbers = #tpu.dot_dimension_numbers<[1], [0], [0], [1], [0, 0, 1, 1], [], []>, precision = #tpu.contract_precision<fp32>} : vector<2x16xf32>, vector<16x16xf32>, vector<2x16xf32> -> vector<2x16xf32>
    %25 = vector.extract_strided_slice %6 {offsets = [0, 3, 0], sizes = [2, 1, 16], strides = [1, 1, 1]} : vector<2x8x16xf32> to vector<2x1x16xf32>
    %26 = vector.shape_cast %25 : vector<2x1x16xf32> to vector<2x16xf32>
    %27 = arith.addf %26, %24 : vector<2x16xf32>
    %28 = math.tanh %27 : vector<2x16xf32>
    %cst_12 = arith.constant dense<0.000000e+00> : vector<2x16xf32>
    %29 = tpu.matmul %28, %7, %cst_12 {dimension_numbers = #tpu.dot_dimension_numbers<[1], [0], [0], [1], [0, 0, 1, 1], [], []>, precision = #tpu.contract_precision<fp32>} : vector<2x16xf32>, vector<16x16xf32>, vector<2x16xf32> -> vector<2x16xf32>
    %30 = vector.extract_strided_slice %6 {offsets = [0, 4, 0], sizes = [2, 1, 16], strides = [1, 1, 1]} : vector<2x8x16xf32> to vector<2x1x16xf32>
    %31 = vector.shape_cast %30 : vector<2x1x16xf32> to vector<2x16xf32>
    %32 = arith.addf %31, %29 : vector<2x16xf32>
    %33 = math.tanh %32 : vector<2x16xf32>
    %cst_13 = arith.constant dense<0.000000e+00> : vector<2x16xf32>
    %34 = tpu.matmul %33, %7, %cst_13 {dimension_numbers = #tpu.dot_dimension_numbers<[1], [0], [0], [1], [0, 0, 1, 1], [], []>, precision = #tpu.contract_precision<fp32>} : vector<2x16xf32>, vector<16x16xf32>, vector<2x16xf32> -> vector<2x16xf32>
    %35 = vector.extract_strided_slice %6 {offsets = [0, 5, 0], sizes = [2, 1, 16], strides = [1, 1, 1]} : vector<2x8x16xf32> to vector<2x1x16xf32>
    %36 = vector.shape_cast %35 : vector<2x1x16xf32> to vector<2x16xf32>
    %37 = arith.addf %36, %34 : vector<2x16xf32>
    %38 = math.tanh %37 : vector<2x16xf32>
    %cst_14 = arith.constant dense<0.000000e+00> : vector<2x16xf32>
    %39 = tpu.matmul %38, %7, %cst_14 {dimension_numbers = #tpu.dot_dimension_numbers<[1], [0], [0], [1], [0, 0, 1, 1], [], []>, precision = #tpu.contract_precision<fp32>} : vector<2x16xf32>, vector<16x16xf32>, vector<2x16xf32> -> vector<2x16xf32>
    %40 = vector.extract_strided_slice %6 {offsets = [0, 6, 0], sizes = [2, 1, 16], strides = [1, 1, 1]} : vector<2x8x16xf32> to vector<2x1x16xf32>
    %41 = vector.shape_cast %40 : vector<2x1x16xf32> to vector<2x16xf32>
    %42 = arith.addf %41, %39 : vector<2x16xf32>
    %43 = math.tanh %42 : vector<2x16xf32>
    %cst_15 = arith.constant dense<0.000000e+00> : vector<2x16xf32>
    %44 = tpu.matmul %43, %7, %cst_15 {dimension_numbers = #tpu.dot_dimension_numbers<[1], [0], [0], [1], [0, 0, 1, 1], [], []>, precision = #tpu.contract_precision<fp32>} : vector<2x16xf32>, vector<16x16xf32>, vector<2x16xf32> -> vector<2x16xf32>
    %45 = vector.extract_strided_slice %6 {offsets = [0, 7, 0], sizes = [2, 1, 16], strides = [1, 1, 1]} : vector<2x8x16xf32> to vector<2x1x16xf32>
    %46 = vector.shape_cast %45 : vector<2x1x16xf32> to vector<2x16xf32>
    %47 = arith.addf %46, %44 : vector<2x16xf32>
    %48 = math.tanh %47 : vector<2x16xf32>
    %c0_16 = arith.constant 0 : index
    %c0_17 = arith.constant 0 : index
    %49 = vector.load %arg4[%c0_16, %c0_17] : memref<1x16xf32, #tpu.memory_space<vmem>>, vector<1x16xf32>
    %50 = vector.broadcast %49 : vector<1x16xf32> to vector<2x16xf32>
    %51 = arith.mulf %48, %50 : vector<2x16xf32>
    %cst_18 = arith.constant dense<0.000000e+00> : vector<2xf32>
    %52 = vector.multi_reduction <add>, %51, %cst_18 [1] : vector<2x16xf32> to vector<2xf32>
    %53 = vector.shape_cast %52 : vector<2xf32> to vector<2x1xf32>
    %c0_19 = arith.constant 0 : index
    %54 = memref.load %arg5[%c0_19] : memref<1xf32, #tpu.memory_space<smem>>
    %55 = vector.broadcast %54 : f32 to vector<2x1xf32>
    %56 = arith.addf %53, %55 : vector<2x1xf32>
    %57 = arith.negf %56 : vector<2x1xf32>
    %58 = math.exp %57 : vector<2x1xf32>
    %cst_20 = arith.constant 1.000000e+00 : f32
    %59 = vector.broadcast %cst_20 : f32 to vector<2x1xf32>
    %60 = arith.addf %59, %58 : vector<2x1xf32>
    %61 = arith.divf %59, %60 : vector<2x1xf32>
    %c0_21 = arith.constant 0 : index
    %c0_22 = arith.constant 0 : index
    %62 = vector.load %arg6[%c0_21, %c0_22] : memref<2x1xf32, #tpu.memory_space<vmem>>, vector<2x1xf32>
    tpu.vector_store %arg6[%c0_21, %c0_22], %61 {strides = array<i32>} : memref<2x1xf32, #tpu.memory_space<vmem>>, vector<2x1xf32>,
    return
  }
}

</mosaic_0001>

<bundles_post_ra>
// kernel: tpu_custom_call.1
= control target key start
LH: loop header
LB: loop body
LE: loop exit
PB: predicated region body
PF: predicated region fallthrough
CT: control target
= control target key end

     0   :  { %v5327_v0 = vmov 0.0|0.0   ;;  %vm5328_vm0 = vmmov 0   ;;  %v5329_v4 = vmov 0.0   ;;  %vm37_vm1 = vcmask 261120   ;;  %s5715_s1 = inlined_call_operand.vmem [shape: f32[32,16], index: 1, kind: input, shape index: {}]   ;;  %s5716_s2 = inlined_call_operand.vmem [shape: f32[16,16], index: 2, kind: input, shape index: {}]   ;;  %s5717_s0 = inlined_call_operand.vmem [shape: f32[16,32], index: 0, kind: input, shape index: {}]   ;;  %s5718_s3 = inlined_call_operand.vmem [shape: f32[1,16], index: 3, kind: input, shape index: {}]   ;;  %s5719_s4 = inlined_call_operand.vmem [shape: f32[1,16], index: 4, kind: input, shape index: {}]   ;;  %s5720_s5 = inlined_call_operand.<no memory space> [shape: f32[1], index: 5, kind: input, shape index: {}]   ;;  %s5721_s6 = inlined_call_operand.vmem [shape: f32[2,1], index: 6, kind: output, shape index: {}]  }
   0x1   :  { %5048 = vmatprep.subr.bf16.mxu1 %v5327_v0  ;;  %v26_v1 = vld [vmem:[%s5715_s1] sm:$0xff]  ;;  %v27_v2 = vld [vmem:[%s5715_s1 + $0x8] sm:$0xff]  ;;  %4668 = vmatprep.mubr.msk.f32.mxu1 %vm5328_vm0, %v5329_v4  ;;  %v28_v9 = vld [vmem:[%s5715_s1 + $0x10] sm:$0xff]  ;;  %vm1048_vm2 = vcmask 1041409   ;;  %vm574_vm3 = vcmask 130048   ;;  %vm4382_vm4 = vcmask 130055  }
   0x2   :  { %v572_v3 = vld [vmem:[%s5716_s2] sm:$0xff]  ;;  %v45_v5 = vand.u32 4294901760, %v26_v1  ;;  %v48_v6 = vand.u32 4294901760, %v27_v2  ;;  %v573_v7 = vld [vmem:[%s5716_s2 + $0x8] sm:$0xff]  ;;  %v29_v10 = vld [vmem:[%s5715_s1 + $0x18] sm:$0xff]  ;;  %v51_v12 = vand.u32 4294901760, %v28_v9 }
   0x3   :  { %v579_v8 = vand.u32 4294901760, %v572_v3  ;;  %v582_v11 = vand.u32 4294901760, %v573_v7  ;;  %v54_v13 = vand.u32 4294901760, %v29_v10  ;;  %v24_v14 = vld [vmem:[%s5717_s0] sm:$0xff]  ;;  %v25_v15 = vld [vmem:[%s5717_s0 + $0x8] sm:$0xff]  ;;  %vm4386_vm5 = vcmask 122880  }
   0x4   :  { %v5392_v16 = vpack.c.bf16 %v48_v6, %v45_v5  ;;  %v39_v17 = vsel %vm37_vm1, %v24_v14, 0  ;;  %v42_v18 = vsel %vm37_vm1, %v25_v15, 0  ;;  %v5394_v19 = vsub.f32 %v26_v1, %v45_v5 }
   0x5   :  { %v5396_v20 = vpack.c.bf16 %v582_v11, %v579_v8  ;;  %v5398_v21 = vpack.c.bf16 %v54_v13, %v51_v12  ;;  %v5400_v22 = vand.u32 4294901760, %v39_v17  ;;  %v5402_v23 = vand.u32 4294901760, %v42_v18 }
   0x6   :  { %5001 = vmatprep.subr.bf16.mxu0 %v5392_v16  ;;  %v136_v24 = vand.u32 4294901760, %v5394_v19  ;;  %v5406_v25 = vsub.f32 %v27_v2, %v48_v6  ;;  %v5408_v26 = vsub.f32 %v572_v3, %v579_v8  ;;  %v5410_v27 = vsub.f32 %v573_v7, %v582_v11  ;;  %v4414_v3 = vld [vmem:[%s5718_s3] ss:$0 sm:$0xff] }
   0x7   :  { %5050 = vmatpush3.bf16.msra.mxu1 %v5396_v20  ;;  %5003 = vmatpush3.bf16.msra.mxu0 %v5392_v16  ;;  %v5415_v28 = vsub.f32 %v39_v17, %v5400_v22  ;;  %v5418_v29 = vsub.f32 %v42_v18, %v5402_v23  ;;  %v5420_v30 = vsub.f32 %v28_v9, %v51_v12  ;;  %vm4406_vm6 = vcmask 7175  }
   0x8   :  { %5005 = vmatprep.subr.bf16.mxu0 %v5398_v21  ;;  %5051 = vmatprep.subr.bf16.mxu1 %v5327_v0  ;;  %v137_v31 = vsub.f32 %v5394_v19, %v136_v24  ;;  %v143_v32 = vand.u32 4294901760, %v5406_v25  ;;  %v658_v33 = vand.u32 4294901760, %v5408_v26  ;;  %v665_v34 = vand.u32 4294901760, %v5410_v27 }
   0x9   :  { %v115_v35 = vand.u32 4294901760, %v5415_v28  ;;  %v125_v36 = vand.u32 4294901760, %v5418_v29  ;;  %v150_v37 = vand.u32 4294901760, %v5420_v30  ;;  %v156_v38 = vsub.f32 %v29_v10, %v54_v13 }
   0xa   :  { %4669 = vmatmul.mubr.f32.vlgmr.msra.gmra.mrb[0].mxu1 %v5329_v4  ;;  %v138_v39 = vand.u32 4294901760, %v137_v31  ;;  %v144_v40 = vsub.f32 %v5406_v25, %v143_v32  ;;  %v659_v41 = vsub.f32 %v5408_v26, %v658_v33  ;;  %v666_v42 = vsub.f32 %v5410_v27, %v665_v34 }
   0xb   :  { %5007 = vmatpush3.bf16.msra.mxu0 %v5398_v21  ;;  %v116_v43 = vsub.f32 %v5415_v28, %v115_v35  ;;  %v126_v44 = vsub.f32 %v5418_v29, %v125_v36  ;;  %4675 = vmatprep.mubr.msk.f32.mxu1 %vm5328_vm0, %v5329_v4  ;;  %v151_v45 = vsub.f32 %v5420_v30, %v150_v37  ;;  %v157_v46 = vand.u32 4294901760, %v156_v38 }
   0xc   :  { %v145_v47 = vand.u32 4294901760, %v144_v40  ;;  %v660_v48 = vand.u32 4294901760, %v659_v41  ;;  %v667_v49 = vand.u32 4294901760, %v666_v42  ;;  %v5450_v58 = vpack.c.bf16 %v5410_v27, %v5408_v26 }
   0xd   :  { %v117_v50 = vand.u32 4294901760, %v116_v43  ;;  %v127_v51 = vand.u32 4294901760, %v126_v44  ;;  %v152_v52 = vand.u32 4294901760, %v151_v45  ;;  %v158_v53 = vsub.f32 %v156_v38, %v157_v46 }
   0xe   :  { %v5008_v54 = vpack.c.bf16 %v145_v47, %v138_v39  ;;  %v5445_v55 = vpack.c.bf16 %v667_v49, %v660_v48  ;;  %v5016_v59 = vpack.c.bf16 %v5406_v25, %v5394_v19  ;;  %v5020_v60 = vpack.c.bf16 %v156_v38, %v5420_v30 }
   0xf   :  { %4606 = vmatprep.mubr.f32.mxu0 %v117_v50  ;;  %v159_v56 = vand.u32 4294901760, %v158_v53  ;;  %v5472_v61 = vpack.c.bf16 %v665_v34, %v658_v33  ;;  %v5032_v62 = vpack.c.bf16 %v143_v32, %v136_v24  ;;  %v5036_v63 = vpack.c.bf16 %v157_v46, %v150_v37 }
  0x10   :  { %4607 = vmatmul.mubr.f32.vlgmr.msra.gmra.mrb[0].mxu0 %v127_v51  ;;  %5009 = vmatprep.subr.bf16.mxu0 %v5008_v54  ;;  %vm4408_vm7 = vcmask 0  }
  0x11   :  { %5053 = vmatpush3.bf16.msra.mxu1 %v5445_v55  ;;  %5011 = vmatpush3.bf16.msra.mxu0 %v5008_v54  ;;  %v5012_v57 = vpack.c.bf16 %v159_v56, %v152_v52 }
  0x12   :  { %4617 = vmatprep.mubr.f32.mxu0 %v5400_v22  ;;  %5054 = vmatprep.subr.bf16.mxu1 %v5327_v0 }
  0x13   :  { %5013 = vmatprep.subr.bf16.mxu0 %v5012_v57 }
  0x14   :  { %4676 = vmatmul.mubr.f32.vlgmr.msra.gmra.mrb[0].mxu1 %v5329_v4 }
  0x15   :  { %5015 = vmatpush3.bf16.msra.mxu0 %v5012_v57  ;;  %5056 = vmatpush3.bf16.msra.mxu1 %v5450_v58 }
  0x16   :  { %5017 = vmatprep.subr.bf16.mxu0 %v5016_v59  ;;  %4682 = vmatprep.mubr.msk.f32.mxu1 %vm5328_vm0, %v5329_v4 }
  0x17   :  { %5057 = vmatprep.subr.bf16.mxu1 %v5327_v0 }
  0x18   :  { %4618 = vmatmul.mubr.f32.vlgmr.msra.gmra.mrb[0].mxu0 %v5402_v23 }
  0x19   :  { %5019 = vmatpush3.bf16.msra.mxu0 %v5016_v59  ;;  %4628 = vmatprep.mubr.f32.mxu0 %v5415_v28 }
  0x1a   :  { %5021 = vmatprep.subr.bf16.mxu0 %v5020_v60 }
  0x1c   :  { %4683 = vmatmul.mubr.f32.vlgmr.msra.gmra.mrb[0].mxu1 %v5329_v4 }
  0x1d   :  { %5023 = vmatpush3.bf16.msra.mxu0 %v5020_v60  ;;  %5059 = vmatpush3.bf16.msra.mxu1 %v5396_v20 }
  0x1e   :  { %5025 = vmatprep.subr.bf16.mxu0 %v5392_v16  ;;  %4689 = vmatprep.mubr.msk.f32.mxu1 %vm5328_vm0, %v5329_v4 }
  0x1f   :  { %5060 = vmatprep.subr.bf16.mxu1 %v5327_v0 }
  0x20   :  { %4629 = vmatmul.mubr.f32.vlgmr.msra.gmra.mrb[0].mxu0 %v5418_v29 }
  0x21   :  { %5027 = vmatpush3.bf16.msra.mxu0 %v5392_v16  ;;  %4639 = vmatprep.mubr.f32.mxu0 %v115_v35 }
  0x22   :  { %5029 = vmatprep.subr.bf16.mxu0 %v5398_v21 }
  0x24   :  { %4690 = vmatmul.mubr.f32.vlgmr.msra.gmra.mrb[0].mxu1 %v5329_v4 }
  0x25   :  { %5031 = vmatpush3.bf16.msra.mxu0 %v5398_v21  ;;  %5062 = vmatpush3.bf16.msra.mxu1 %v5472_v61 }
  0x26   :  { %5033 = vmatprep.subr.bf16.mxu0 %v5032_v62  ;;  %4696 = vmatprep.mubr.msk.f32.mxu1 %vm5328_vm0, %v5329_v4 }
  0x27   :  { %5063 = vmatprep.subr.bf16.mxu1 %v5327_v0 }
  0x28   :  { %4640 = vmatmul.mubr.f32.vlgmr.msra.gmra.mrb[0].mxu0 %v125_v36 }
  0x29   :  { %5035 = vmatpush3.bf16.msra.mxu0 %v5032_v62  ;;  %4650 = vmatprep.mubr.f32.mxu0 %v5400_v22 }
  0x2a   :  { %5037 = vmatprep.subr.bf16.mxu0 %v5036_v63 }
  0x2c   :  { %4697 = vmatmul.mubr.f32.vlgmr.msra.gmra.mrb[0].mxu1 %v5329_v4 }
  0x2d   :  { %5039 = vmatpush3.bf16.msra.mxu0 %v5036_v63  ;;  %5065 = vmatpush3.bf16.msra.mxu1 %v5396_v20 }
  0x2e   :  { %5041 = vmatprep.subr.bf16.mxu0 %v5392_v16  ;;  %4703 = vmatprep.mubr.msk.f32.mxu1 %vm5328_vm0, %v5329_v4 }
  0x2f   :  { %5066 = vmatprep.subr.bf16.mxu1 %v5327_v0 }
  0x30   :  { %4651 = vmatmul.mubr.f32.vlgmr.msra.gmra.mrb[0].mxu0 %v5402_v23 }
  0x31   :  { %5043 = vmatpush3.bf16.msra.mxu0 %v5392_v16  ;;  %4661 = vmatprep.mubr.f32.mxu0 %v5400_v22 }
  0x32   :  { %5045 = vmatprep.subr.bf16.mxu0 %v5398_v21 }
  0x34   :  { %4704 = vmatmul.mubr.f32.vlgmr.msra.gmra.mrb[0].mxu1 %v5329_v4 }
  0x35   :  { %5047 = vmatpush3.bf16.msra.mxu0 %v5398_v21  ;;  %5068 = vmatpush3.bf16.msra.mxu1 %v5396_v20 }
  0x36   :  { %4710 = vmatprep.mubr.msk.f32.mxu1 %vm5328_vm0, %v5329_v4  ;;  %5069 = vmatprep.subr.bf16.mxu1 %v5327_v0 }
  0x37   :  { %5084 = vmatprep.subr.bf16.mxu0 %v5327_v0 }
  0x38   :  { %4662 = vmatmul.mubr.f32.vlgmr.msra.gmra.mrb[0].mxu0 %v5402_v23 }
  0x39   :  { %5086 = vmatpush3.bf16.msra.mxu0 %v5396_v20  ;;  %4752 = vmatprep.mubr.msk.f32.mxu0 %vm5328_vm0, %v5329_v4 }
  0x3a   :  { %5087 = vmatprep.subr.bf16.mxu0 %v5327_v0 }
 0x107   :  { %v1033_v1 = vpop.f32.mrb[0].mxu1 }
 0x108   :  { %v4705_v2 = vpop.f32.mrb[1].mxu1  ;;  %v1038_v6 = vrot.slane %v1033_v1, 1 }
 0x10b   :  { %v4663_v5 = vpop.f32.mrb[0].mxu0 }
 0x10c   :  { %v5511_v7 = vadd.f32 %v4663_v5, %v4414_v3  ;;  %v562_v8 = vpop.f32.mrb[1].mxu0 }
 0x10d   :  { %v5513_v9 = vadd.f32 %v4414_v3, %v562_v8 }
 0x10e   :  { %v1042_v10 = vadd.f32 %v5511_v7, %v1038_v6 }
 0x10f   :  { %v1041_v11 = vadd.f32 %v5513_v9, %v1033_v1 }
 0x110   :  { %5287 = vtanh.f32 %v1042_v10 }
 0x111   :  { %5289 = vtanh.f32 %v1041_v11 }
 0x11a   :  { %v5288_v12 = vpop.eup %5287 }
 0x11b   :  { %v5290_v13 = vpop.eup %5289  ;;  %v1047_v14 = vrot.slane %v5288_v12, 7 }
 0x11d   :  { %v1049_v15 = vsel %vm1048_vm2, %v1047_v14, %v5290_v13 }
 0x11e   :  { %v1050_v16 = vsel %vm574_vm3, %v1049_v15, 0 }
 0x11f   :  { %v1119_v17 = vand.u32 4294901760, %v1050_v16 }
 0x121   :  { %v1120_v18 = vsub.f32 %v1050_v16, %v1119_v17 }
 0x123   :  { %v1121_v19 = vand.u32 4294901760, %v1120_v18 }
 0x125   :  { %v1122_v21 = vsub.f32 %v1120_v18, %v1121_v19 }
 0x127   :  { %v1123_v22 = vand.u32 4294901760, %v1122_v21 }
 0x129   :  { %4711 = vmatmul.mubr.f32.vlgmr.msra.gmra.mrb[2].mxu1 %v1123_v22 }
 0x12a   :  { %5071 = vmatpush3.bf16.msra.mxu1 %v5445_v55  ;;  %4717 = vmatprep.mubr.msk.f32.mxu1 %vm5328_vm0, %v5329_v4 }
 0x12b   :  { %5072 = vmatprep.subr.bf16.mxu1 %v5327_v0 }
 0x131   :  { %4718 = vmatmul.mubr.f32.vlgmr.msra.gmra.mrb[2].mxu1 %v1119_v17 }
 0x132   :  { %5074 = vmatpush3.bf16.msra.mxu1 %v5450_v58  ;;  %4724 = vmatprep.mubr.msk.f32.mxu1 %vm5328_vm0, %v5329_v4 }
 0x133   :  { %5075 = vmatprep.subr.bf16.mxu1 %v5327_v0 }
 0x139   :  { %4725 = vmatmul.mubr.f32.vlgmr.msra.gmra.mrb[2].mxu1 %v1120_v18 }
 0x13a   :  { %5077 = vmatpush3.bf16.msra.mxu1 %v5396_v20  ;;  %4731 = vmatprep.mubr.msk.f32.mxu1 %vm5328_vm0, %v5329_v4 }
 0x13b   :  { %5078 = vmatprep.subr.bf16.mxu1 %v5327_v0 }
 0x141   :  { %4732 = vmatmul.mubr.f32.vlgmr.msra.gmra.mrb[2].mxu1 %v1121_v19 }
 0x142   :  { %5080 = vmatpush3.bf16.msra.mxu1 %v5472_v61  ;;  %4738 = vmatprep.mubr.msk.f32.mxu1 %vm5328_vm0, %v5329_v4 }
 0x143   :  { %5081 = vmatprep.subr.bf16.mxu1 %v5327_v0 }
 0x149   :  { %4739 = vmatmul.mubr.f32.vlgmr.msra.gmra.mrb[2].mxu1 %v1119_v17 }
 0x14a   :  { %5083 = vmatpush3.bf16.msra.mxu1 %v5396_v20  ;;  %4745 = vmatprep.mubr.msk.f32.mxu1 %vm5328_vm0, %v5329_v4 }
 0x14b   :  { %5102 = vmatprep.subr.bf16.mxu1 %v5327_v0 }
 0x151   :  { %4746 = vmatmul.mubr.f32.vlgmr.msra.gmra.mrb[2].mxu1 %v1119_v17 }
 0x152   :  { %5104 = vmatpush3.bf16.msra.mxu1 %v5396_v20  ;;  %4794 = vmatprep.mubr.msk.f32.mxu1 %vm5328_vm0, %v5329_v4 }
 0x153   :  { %5105 = vmatprep.subr.bf16.mxu1 %v5327_v0 }
 0x224   :  { %v1507_v23 = vpop.f32.mrb[2].mxu1 }
 0x225   :  { %v1512_v24 = vrot.slane %v1507_v23, 7  ;;  %v4747_v25 = vpop.f32.mrb[3].mxu1  ;;  %v1516_v27 = vadd.f32 %v5511_v7, %v1507_v23 }
 0x227   :  { %v1515_v26 = vadd.f32 %v5513_v9, %v1512_v24 }
 0x229   :  { %5291 = vtanh.f32 %v1515_v26 }
 0x22a   :  { %5293 = vtanh.f32 %v1516_v27 }
 0x233   :  { %v5292_v28 = vpop.eup %5291 }
 0x234   :  { %v1521_v29 = vrot.slane %v5292_v28, 1  ;;  %v5294_v30 = vpop.eup %5293 }
 0x236   :  { %v1522_v31 = vsel %vm1048_vm2, %v5294_v30, %v1521_v29 }
 0x237   :  { %v1523_v32 = vsel %vm574_vm3, %v1522_v31, 0 }
 0x238   :  { %v1592_v33 = vand.u32 4294901760, %v1523_v32 }
 0x23a   :  { %v1593_v34 = vsub.f32 %v1523_v32, %v1592_v33 }
 0x23c   :  { %v1594_v35 = vand.u32 4294901760, %v1593_v34 }
 0x23e   :  { %v1595_v36 = vsub.f32 %v1593_v34, %v1594_v35 }
 0x240   :  { %v1596_v37 = vand.u32 4294901760, %v1595_v36 }
 0x242   :  { %4753 = vmatmul.mubr.f32.vlgmr.msra.gmra.mrb[2].mxu0 %v1596_v37 }
 0x243   :  { %5089 = vmatpush3.bf16.msra.mxu0 %v5445_v55  ;;  %4759 = vmatprep.mubr.msk.f32.mxu0 %vm5328_vm0, %v5329_v4 }
 0x244   :  { %5090 = vmatprep.subr.bf16.mxu0 %v5327_v0 }
 0x24a   :  { %4760 = vmatmul.mubr.f32.vlgmr.msra.gmra.mrb[2].mxu0 %v1592_v33 }
 0x24b   :  { %5092 = vmatpush3.bf16.msra.mxu0 %v5450_v58  ;;  %4766 = vmatprep.mubr.msk.f32.mxu0 %vm5328_vm0, %v5329_v4 }
 0x24c   :  { %5093 = vmatprep.subr.bf16.mxu0 %v5327_v0 }
 0x252   :  { %4767 = vmatmul.mubr.f32.vlgmr.msra.gmra.mrb[2].mxu0 %v1593_v34 }
 0x253   :  { %5095 = vmatpush3.bf16.msra.mxu0 %v5396_v20  ;;  %4773 = vmatprep.mubr.msk.f32.mxu0 %vm5328_vm0, %v5329_v4 }
 0x254   :  { %5096 = vmatprep.subr.bf16.mxu0 %v5327_v0 }
 0x25a   :  { %4774 = vmatmul.mubr.f32.vlgmr.msra.gmra.mrb[2].mxu0 %v1594_v35 }
 0x25b   :  { %5098 = vmatpush3.bf16.msra.mxu0 %v5472_v61  ;;  %4780 = vmatprep.mubr.msk.f32.mxu0 %vm5328_vm0, %v5329_v4 }
 0x25c   :  { %5099 = vmatprep.subr.bf16.mxu0 %v5327_v0 }
 0x262   :  { %4781 = vmatmul.mubr.f32.vlgmr.msra.gmra.mrb[2].mxu0 %v1592_v33 }
 0x263   :  { %5101 = vmatpush3.bf16.msra.mxu0 %v5396_v20  ;;  %4787 = vmatprep.mubr.msk.f32.mxu0 %vm5328_vm0, %v5329_v4 }
 0x264   :  { %5120 = vmatprep.subr.bf16.mxu0 %v5327_v0 }
 0x26a   :  { %4788 = vmatmul.mubr.f32.vlgmr.msra.gmra.mrb[2].mxu0 %v1592_v33 }
 0x26b   :  { %5122 = vmatpush3.bf16.msra.mxu0 %v5396_v20  ;;  %4836 = vmatprep.mubr.msk.f32.mxu0 %vm5328_vm0, %v5329_v4 }
 0x26c   :  { %5123 = vmatprep.subr.bf16.mxu0 %v5327_v0 }
 0x33d   :  { %v1980_v38 = vpop.f32.mrb[2].mxu0 }
 0x33e   :  { %v1985_v39 = vrot.slane %v1980_v38, 6  ;;  %v1986_v40 = vrot.slane %v1980_v38, 7  ;;  %v4789_v41 = vpop.f32.mrb[3].mxu0 }
 0x340   :  { %v1989_v42 = vadd.f32 %v5513_v9, %v1985_v39  ;;  %v1990_v43 = vadd.f32 %v5511_v7, %v1986_v40 }
 0x342   :  { %5295 = vtanh.f32 %v1989_v42 }
 0x343   :  { %5297 = vtanh.f32 %v1990_v43 }
 0x34c   :  { %v5296_v44 = vpop.eup %5295 }
 0x34d   :  { %v5298_v45 = vpop.eup %5297  ;;  %v1995_v46 = vrot.slane %v5296_v44, 2 }
 0x34e   :  { %v1996_v47 = vrot.slane %v5298_v45, 1 }
 0x350   :  { %v1997_v48 = vsel %vm1048_vm2, %v1996_v47, %v1995_v46 }
 0x351   :  { %v1998_v49 = vsel %vm574_vm3, %v1997_v48, 0 }
 0x352   :  { %v2067_v50 = vand.u32 4294901760, %v1998_v49 }
 0x354   :  { %v2068_v51 = vsub.f32 %v1998_v49, %v2067_v50 }
 0x356   :  { %v2069_v52 = vand.u32 4294901760, %v2068_v51 }
 0x358   :  { %v2070_v53 = vsub.f32 %v2068_v51, %v2069_v52 }
 0x35a   :  { %v2071_v54 = vand.u32 4294901760, %v2070_v53 }
 0x35c   :  { %4795 = vmatmul.mubr.f32.vlgmr.msra.gmra.mrb[4].mxu1 %v2071_v54 }
 0x35d   :  { %5107 = vmatpush3.bf16.msra.mxu1 %v5445_v55  ;;  %4801 = vmatprep.mubr.msk.f32.mxu1 %vm5328_vm0, %v5329_v4 }
 0x35e   :  { %5108 = vmatprep.subr.bf16.mxu1 %v5327_v0 }
 0x364   :  { %4802 = vmatmul.mubr.f32.vlgmr.msra.gmra.mrb[4].mxu1 %v2067_v50 }
 0x365   :  { %5110 = vmatpush3.bf16.msra.mxu1 %v5450_v58  ;;  %4808 = vmatprep.mubr.msk.f32.mxu1 %vm5328_vm0, %v5329_v4 }
 0x366   :  { %5111 = vmatprep.subr.bf16.mxu1 %v5327_v0 }
 0x36c   :  { %4809 = vmatmul.mubr.f32.vlgmr.msra.gmra.mrb[4].mxu1 %v2068_v51 }
 0x36d   :  { %5113 = vmatpush3.bf16.msra.mxu1 %v5396_v20  ;;  %4815 = vmatprep.mubr.msk.f32.mxu1 %vm5328_vm0, %v5329_v4 }
 0x36e   :  { %5114 = vmatprep.subr.bf16.mxu1 %v5327_v0 }
 0x374   :  { %4816 = vmatmul.mubr.f32.vlgmr.msra.gmra.mrb[4].mxu1 %v2069_v52 }
 0x375   :  { %5116 = vmatpush3.bf16.msra.mxu1 %v5472_v61  ;;  %4822 = vmatprep.mubr.msk.f32.mxu1 %vm5328_vm0, %v5329_v4 }
 0x376   :  { %5117 = vmatprep.subr.bf16.mxu1 %v5327_v0 }
 0x37c   :  { %4823 = vmatmul.mubr.f32.vlgmr.msra.gmra.mrb[4].mxu1 %v2067_v50 }
 0x37d   :  { %5119 = vmatpush3.bf16.msra.mxu1 %v5396_v20  ;;  %4829 = vmatprep.mubr.msk.f32.mxu1 %vm5328_vm0, %v5329_v4 }
 0x37e   :  { %5138 = vmatprep.subr.bf16.mxu1 %v5327_v0 }
 0x384   :  { %4830 = vmatmul.mubr.f32.vlgmr.msra.gmra.mrb[4].mxu1 %v2067_v50 }
 0x385   :  { %5140 = vmatpush3.bf16.msra.mxu1 %v5396_v20  ;;  %4878 = vmatprep.mubr.msk.f32.mxu1 %vm5328_vm0, %v5329_v4 }
 0x386   :  { %5141 = vmatprep.subr.bf16.mxu1 %v5327_v0 }
 0x457   :  { %v2455_v56 = vpop.f32.mrb[4].mxu1 }
 0x458   :  { %v2460_v57 = vrot.slane %v2455_v56, 5  ;;  %v2461_v59 = vrot.slane %v2455_v56, 6  ;;  %v4831_v60 = vpop.f32.mrb[5].mxu1 }
 0x45a   :  { %v2464_v62 = vadd.f32 %v5513_v9, %v2460_v57  ;;  %v2465_v63 = vadd.f32 %v5511_v7, %v2461_v59 }
 0x45c   :  { %5299 = vtanh.f32 %v2464_v62 }
 0x45d   :  { %5301 = vtanh.f32 %v2465_v63 }
 0x466   :  { %v5300_v1 = vpop.eup %5299 }
 0x467   :  { %v5302_v2 = vpop.eup %5301  ;;  %v2470_v3 = vrot.slane %v5300_v1, 3 }
 0x468   :  { %v2471_v5 = vrot.slane %v5302_v2, 2 }
 0x46a   :  { %v2472_v6 = vsel %vm1048_vm2, %v2471_v5, %v2470_v3 }
 0x46b   :  { %v2473_v8 = vsel %vm574_vm3, %v2472_v6, 0 }
 0x46c   :  { %v2542_v10 = vand.u32 4294901760, %v2473_v8 }
 0x46e   :  { %v2543_v11 = vsub.f32 %v2473_v8, %v2542_v10 }
 0x470   :  { %v2544_v12 = vand.u32 4294901760, %v2543_v11 }
 0x472   :  { %v2545_v13 = vsub.f32 %v2543_v11, %v2544_v12 }
 0x474   :  { %v2546_v14 = vand.u32 4294901760, %v2545_v13 }
 0x476   :  { %4837 = vmatmul.mubr.f32.vlgmr.msra.gmra.mrb[4].mxu0 %v2546_v14 }
 0x477   :  { %5125 = vmatpush3.bf16.msra.mxu0 %v5445_v55  ;;  %4843 = vmatprep.mubr.msk.f32.mxu0 %vm5328_vm0, %v5329_v4 }
 0x478   :  { %5126 = vmatprep.subr.bf16.mxu0 %v5327_v0 }
 0x47e   :  { %4844 = vmatmul.mubr.f32.vlgmr.msra.gmra.mrb[4].mxu0 %v2542_v10 }
 0x47f   :  { %5128 = vmatpush3.bf16.msra.mxu0 %v5450_v58  ;;  %4850 = vmatprep.mubr.msk.f32.mxu0 %vm5328_vm0, %v5329_v4 }
 0x480   :  { %5129 = vmatprep.subr.bf16.mxu0 %v5327_v0 }
 0x486   :  { %4851 = vmatmul.mubr.f32.vlgmr.msra.gmra.mrb[4].mxu0 %v2543_v11 }
 0x487   :  { %5131 = vmatpush3.bf16.msra.mxu0 %v5396_v20  ;;  %4857 = vmatprep.mubr.msk.f32.mxu0 %vm5328_vm0, %v5329_v4 }
 0x488   :  { %5132 = vmatprep.subr.bf16.mxu0 %v5327_v0 }
 0x48e   :  { %4858 = vmatmul.mubr.f32.vlgmr.msra.gmra.mrb[4].mxu0 %v2544_v12 }
 0x48f   :  { %5134 = vmatpush3.bf16.msra.mxu0 %v5472_v61  ;;  %4864 = vmatprep.mubr.msk.f32.mxu0 %vm5328_vm0, %v5329_v4 }
 0x490   :  { %5135 = vmatprep.subr.bf16.mxu0 %v5327_v0 }
 0x496   :  { %4865 = vmatmul.mubr.f32.vlgmr.msra.gmra.mrb[4].mxu0 %v2542_v10 }
 0x497   :  { %5137 = vmatpush3.bf16.msra.mxu0 %v5396_v20  ;;  %4871 = vmatprep.mubr.msk.f32.mxu0 %vm5328_vm0, %v5329_v4 }
 0x498   :  { %5156 = vmatprep.subr.bf16.mxu0 %v5327_v0 }
 0x49e   :  { %4872 = vmatmul.mubr.f32.vlgmr.msra.gmra.mrb[4].mxu0 %v2542_v10 }
 0x49f   :  { %5158 = vmatpush3.bf16.msra.mxu0 %v5396_v20  ;;  %4920 = vmatprep.mubr.msk.f32.mxu0 %vm5328_vm0, %v5329_v4 }
 0x4a0   :  { %5159 = vmatprep.subr.bf16.mxu0 %v5327_v0 }
 0x571   :  { %v2930_v15 = vpop.f32.mrb[4].mxu0 }
 0x572   :  { %v2935_v16 = vrot.slane %v2930_v15, 4  ;;  %v2936_v17 = vrot.slane %v2930_v15, 5  ;;  %v4873_v18 = vpop.f32.mrb[5].mxu0 }
 0x574   :  { %v2939_v19 = vadd.f32 %v5513_v9, %v2935_v16  ;;  %v2940_v21 = vadd.f32 %v5511_v7, %v2936_v17 }
 0x576   :  { %5303 = vtanh.f32 %v2939_v19 }
 0x577   :  { %5305 = vtanh.f32 %v2940_v21 }
 0x580   :  { %v5304_v22 = vpop.eup %5303 }
 0x581   :  { %v5306_v23 = vpop.eup %5305  ;;  %v2945_v24 = vrot.slane %v5304_v22, 4 }
 0x582   :  { %v2946_v25 = vrot.slane %v5306_v23, 3 }
 0x584   :  { %v2947_v26 = vsel %vm1048_vm2, %v2946_v25, %v2945_v24 }
 0x585   :  { %v2948_v27 = vsel %vm574_vm3, %v2947_v26, 0 }
 0x586   :  { %v3017_v28 = vand.u32 4294901760, %v2948_v27 }
 0x588   :  { %v3018_v29 = vsub.f32 %v2948_v27, %v3017_v28 }
 0x58a   :  { %v3019_v30 = vand.u32 4294901760, %v3018_v29 }
 0x58c   :  { %v3020_v31 = vsub.f32 %v3018_v29, %v3019_v30 }
 0x58e   :  { %v3021_v32 = vand.u32 4294901760, %v3020_v31 }
 0x590   :  { %4879 = vmatmul.mubr.f32.vlgmr.msra.gmra.mrb[6].mxu1 %v3021_v32 }
 0x591   :  { %5143 = vmatpush3.bf16.msra.mxu1 %v5445_v55  ;;  %4885 = vmatprep.mubr.msk.f32.mxu1 %vm5328_vm0, %v5329_v4 }
 0x592   :  { %5144 = vmatprep.subr.bf16.mxu1 %v5327_v0 }
 0x598   :  { %4886 = vmatmul.mubr.f32.vlgmr.msra.gmra.mrb[6].mxu1 %v3017_v28 }
 0x599   :  { %5146 = vmatpush3.bf16.msra.mxu1 %v5450_v58  ;;  %4892 = vmatprep.mubr.msk.f32.mxu1 %vm5328_vm0, %v5329_v4 }
 0x59a   :  { %5147 = vmatprep.subr.bf16.mxu1 %v5327_v0 }
 0x5a0   :  { %4893 = vmatmul.mubr.f32.vlgmr.msra.gmra.mrb[6].mxu1 %v3018_v29 }
 0x5a1   :  { %5149 = vmatpush3.bf16.msra.mxu1 %v5396_v20  ;;  %4899 = vmatprep.mubr.msk.f32.mxu1 %vm5328_vm0, %v5329_v4 }
 0x5a2   :  { %5150 = vmatprep.subr.bf16.mxu1 %v5327_v0 }
 0x5a8   :  { %4900 = vmatmul.mubr.f32.vlgmr.msra.gmra.mrb[6].mxu1 %v3019_v30 }
 0x5a9   :  { %5152 = vmatpush3.bf16.msra.mxu1 %v5472_v61  ;;  %4906 = vmatprep.mubr.msk.f32.mxu1 %vm5328_vm0, %v5329_v4 }
 0x5aa   :  { %5153 = vmatprep.subr.bf16.mxu1 %v5327_v0 }
 0x5b0   :  { %4907 = vmatmul.mubr.f32.vlgmr.msra.gmra.mrb[6].mxu1 %v3017_v28 }
 0x5b1   :  { %5155 = vmatpush3.bf16.msra.mxu1 %v5396_v20  ;;  %4913 = vmatprep.mubr.msk.f32.mxu1 %vm5328_vm0, %v5329_v4 }
 0x5b2   :  { %5174 = vmatprep.subr.bf16.mxu1 %v5327_v0 }
 0x5b8   :  { %4914 = vmatmul.mubr.f32.vlgmr.msra.gmra.mrb[6].mxu1 %v3017_v28 }
 0x5b9   :  { %5176 = vmatpush3.bf16.msra.mxu1 %v5396_v20  ;;  %4962 = vmatprep.mubr.msk.f32.mxu1 %vm5328_vm0, %v5329_v4 }
 0x5ba   :  { %5177 = vmatprep.subr.bf16.mxu1 %v5327_v0 }
 0x68b   :  { %v3405_v33 = vpop.f32.mrb[6].mxu1 }
 0x68c   :  { %v3410_v34 = vrot.slane %v3405_v33, 3  ;;  %v3411_v35 = vrot.slane %v3405_v33, 4  ;;  %v4915_v36 = vpop.f32.mrb[7].mxu1 }
 0x68e   :  { %v3414_v37 = vadd.f32 %v5513_v9, %v3410_v34  ;;  %v3415_v38 = vadd.f32 %v5511_v7, %v3411_v35 }
 0x690   :  { %5307 = vtanh.f32 %v3414_v37 }
 0x691   :  { %5309 = vtanh.f32 %v3415_v38 }
 0x69a   :  { %v5308_v39 = vpop.eup %5307 }
 0x69b   :  { %v5310_v40 = vpop.eup %5309  ;;  %v3420_v41 = vrot.slane %v5308_v39, 5 }
 0x69c   :  { %v3421_v42 = vrot.slane %v5310_v40, 4 }
 0x69e   :  { %v3422_v43 = vsel %vm1048_vm2, %v3421_v42, %v3420_v41 }
 0x69f   :  { %v3423_v44 = vsel %vm574_vm3, %v3422_v43, 0 }
 0x6a0   :  { %v3492_v45 = vand.u32 4294901760, %v3423_v44 }
 0x6a2   :  { %v3493_v46 = vsub.f32 %v3423_v44, %v3492_v45 }
 0x6a4   :  { %v3494_v47 = vand.u32 4294901760, %v3493_v46 }
 0x6a6   :  { %v3495_v48 = vsub.f32 %v3493_v46, %v3494_v47 }
 0x6a8   :  { %v3496_v49 = vand.u32 4294901760, %v3495_v48 }
 0x6aa   :  { %4921 = vmatmul.mubr.f32.vlgmr.msra.gmra.mrb[6].mxu0 %v3496_v49 }
 0x6ab   :  { %5161 = vmatpush3.bf16.msra.mxu0 %v5445_v55  ;;  %4927 = vmatprep.mubr.msk.f32.mxu0 %vm5328_vm0, %v5329_v4 }
 0x6ac   :  { %5162 = vmatprep.subr.bf16.mxu0 %v5327_v0 }
 0x6b2   :  { %4928 = vmatmul.mubr.f32.vlgmr.msra.gmra.mrb[6].mxu0 %v3492_v45 }
 0x6b3   :  { %5164 = vmatpush3.bf16.msra.mxu0 %v5450_v58  ;;  %4934 = vmatprep.mubr.msk.f32.mxu0 %vm5328_vm0, %v5329_v4 }
 0x6b4   :  { %5165 = vmatprep.subr.bf16.mxu0 %v5327_v0 }
 0x6ba   :  { %4935 = vmatmul.mubr.f32.vlgmr.msra.gmra.mrb[6].mxu0 %v3493_v46 }
 0x6bb   :  { %5167 = vmatpush3.bf16.msra.mxu0 %v5396_v20  ;;  %4941 = vmatprep.mubr.msk.f32.mxu0 %vm5328_vm0, %v5329_v4 }
 0x6bc   :  { %5168 = vmatprep.subr.bf16.mxu0 %v5327_v0 }
 0x6c2   :  { %4942 = vmatmul.mubr.f32.vlgmr.msra.gmra.mrb[6].mxu0 %v3494_v47 }
 0x6c3   :  { %5170 = vmatpush3.bf16.msra.mxu0 %v5472_v61  ;;  %4948 = vmatprep.mubr.msk.f32.mxu0 %vm5328_vm0, %v5329_v4 }
 0x6c4   :  { %5171 = vmatprep.subr.bf16.mxu0 %v5327_v0 }
 0x6ca   :  { %4949 = vmatmul.mubr.f32.vlgmr.msra.gmra.mrb[6].mxu0 %v3492_v45 }
 0x6cb   :  { %5173 = vmatpush3.bf16.msra.mxu0 %v5396_v20  ;;  %4955 = vmatprep.mubr.msk.f32.mxu0 %vm5328_vm0, %v5329_v4 }
 0x6d2   :  { %4956 = vmatmul.mubr.f32.vlgmr.msra.gmra.mrb[6].mxu0 %v3492_v45 }
 0x7a5   :  { %v3880_v50 = vpop.f32.mrb[6].mxu0 }
 0x7a6   :  { %v3885_v51 = vrot.slane %v3880_v50, 2  ;;  %v3886_v52 = vrot.slane %v3880_v50, 3  ;;  %v4957_v53 = vpop.f32.mrb[7].mxu0 }
 0x7a8   :  { %v3889_v54 = vadd.f32 %v5513_v9, %v3885_v51  ;;  %v3890_v56 = vadd.f32 %v5511_v7, %v3886_v52 }
 0x7aa   :  { %5311 = vtanh.f32 %v3889_v54 }
 0x7ab   :  { %5313 = vtanh.f32 %v3890_v56 }
 0x7b4   :  { %v5312_v57 = vpop.eup %5311 }
 0x7b5   :  { %v5314_v59 = vpop.eup %5313  ;;  %v3895_v60 = vrot.slane %v5312_v57, 6 }
 0x7b6   :  { %v3896_v62 = vrot.slane %v5314_v59, 5 }
 0x7b8   :  { %v3897_v63 = vsel %vm1048_vm2, %v3896_v62, %v3895_v60 }
 0x7b9   :  { %v3898_v1 = vsel %vm574_vm3, %v3897_v63, 0 }
 0x7ba   :  { %v3967_v2 = vand.u32 4294901760, %v3898_v1 }
 0x7bc   :  { %v3968_v3 = vsub.f32 %v3898_v1, %v3967_v2 }
 0x7be   :  { %v3969_v5 = vand.u32 4294901760, %v3968_v3 }
 0x7c0   :  { %v3970_v6 = vsub.f32 %v3968_v3, %v3969_v5 }
 0x7c2   :  { %v3971_v8 = vand.u32 4294901760, %v3970_v6 }
 0x7c4   :  { %4963 = vmatmul.mubr.f32.vlgmr.msra.gmra.mrb[8].mxu1 %v3971_v8 }
 0x7c5   :  { %5179 = vmatpush3.bf16.msra.mxu1 %v5445_v55  ;;  %4969 = vmatprep.mubr.msk.f32.mxu1 %vm5328_vm0, %v5329_v4 }
 0x7c6   :  { %5180 = vmatprep.subr.bf16.mxu1 %v5327_v0 }
 0x7cc   :  { %4970 = vmatmul.mubr.f32.vlgmr.msra.gmra.mrb[8].mxu1 %v3967_v2 }
 0x7cd   :  { %5182 = vmatpush3.bf16.msra.mxu1 %v5450_v58  ;;  %4976 = vmatprep.mubr.msk.f32.mxu1 %vm5328_vm0, %v5329_v4 }
 0x7ce   :  { %5183 = vmatprep.subr.bf16.mxu1 %v5327_v0 }
 0x7d4   :  { %4977 = vmatmul.mubr.f32.vlgmr.msra.gmra.mrb[8].mxu1 %v3968_v3 }
 0x7d5   :  { %5185 = vmatpush3.bf16.msra.mxu1 %v5396_v20  ;;  %4983 = vmatprep.mubr.msk.f32.mxu1 %vm5328_vm0, %v5329_v4 }
 0x7d6   :  { %5186 = vmatprep.subr.bf16.mxu1 %v5327_v0 }
 0x7dc   :  { %4984 = vmatmul.mubr.f32.vlgmr.msra.gmra.mrb[8].mxu1 %v3969_v5 }
 0x7dd   :  { %5188 = vmatpush3.bf16.msra.mxu1 %v5472_v61  ;;  %4990 = vmatprep.mubr.msk.f32.mxu1 %vm5328_vm0, %v5329_v4 }
 0x7de   :  { %5189 = vmatprep.subr.bf16.mxu1 %v5327_v0  ;;  %v4415_v0 = vld [vmem:[%s5719_s4] ss:$0 sm:$0xff] }
 0x7e4   :  { %4991 = vmatmul.mubr.f32.vlgmr.msra.gmra.mrb[8].mxu1 %v3967_v2 }
 0x7e5   :  { %5191 = vmatpush3.bf16.msra.mxu1 %v5396_v20  ;;  %4997 = vmatprep.mubr.msk.f32.mxu1 %vm5328_vm0, %v5329_v4 }
 0x7ec   :  { %4998 = vmatmul.mubr.f32.vlgmr.msra.gmra.mrb[8].mxu1 %v3967_v2 }
 0x8bf   :  { %v4355_v55 = vpop.f32.mrb[8].mxu1 }
 0x8c0   :  { %v4360_v58 = vrot.slane %v4355_v55, 1  ;;  %v4361_v10 = vrot.slane %v4355_v55, 2  ;;  %v4999_v11 = vpop.f32.mrb[9].mxu1 }
 0x8c2   :  { %v4364_v12 = vadd.f32 %v5513_v9, %v4360_v58  ;;  %v4365_v61 = vadd.f32 %v5511_v7, %v4361_v10  ;;  %v4391_v7 = vstv %s5720_s5 }
 0x8c4   :  { %5315 = vtanh.f32 %v4364_v12 }
 0x8c5   :  { %5317 = vtanh.f32 %v4365_v61 }
 0x8ce   :  { %v5316_v13 = vpop.eup %5315 }
 0x8cf   :  { %v5318_v20 = vpop.eup %5317  ;;  %v4375_v14 = vmul.f32 %v5316_v13, %v4415_v0 }
 0x8d0   :  { %v4376_v4 = vmul.f32 %v5318_v20, %v4415_v0 }
 0x8d1   :  { %v4383_v15 = vsel %vm4382_vm4, %v4375_v14, 0.0 }
 0x8d2   :  { %4384 = vadd.xlane.f32.xlu0 %v4383_v15  ;;  %v4379_v16 = vrot.slane %v4376_v4, 7 }
 0x8d4   :  { %v4387_v17 = vsel %vm4386_vm5, %v4379_v16, 0.0 }
 0x8d6   :  { %4388 = vadd.xlane.f32.xlu0 %v4387_v17 }
 0x95f   :  { %v4385_v9 = vpop.xlane.xlu0 %4384 }
 0x960   :  { %v4392_v18 = vadd.f32 %v4391_v7, %v4385_v9 }
 0x962   :  { %v4416_v19 = vmul.f32 -1.442695, %v4392_v18 }
 0x963   :  { %v4389_v21 = vpop.xlane.xlu0 %4388 }
 0x964   :  { %5319 = vpow2.f32 %v4416_v19  ;;  %v4393_v22 = vadd.f32 %v4391_v7, %v4389_v21 }
 0x966   :  { %v4417_v23 = vmul.f32 -1.442695, %v4393_v22 }
 0x968   :  { %5321 = vpow2.f32 %v4417_v23 }
 0x96e   :  { %v5320_v24 = vpop.eup %5319 }
 0x96f   :  { %v4400_v25 = vadd.f32 1.0, %v5320_v24 }
 0x971   :  { %5323 = vrcp.f32 %v4400_v25 }
 0x972   :  { %v5322_v26 = vpop.eup %5321 }
 0x973   :  { %v4401_v27 = vadd.f32 1.0, %v5322_v26 }
 0x975   :  { %5325 = vrcp.f32 %v4401_v27 }
 0x97b   :  { %v5324_v28 = vpop.eup %5323 }
 0x97c   :  { %4407 = vst.msk [vmem:[%s5721_s6 - $0x7] sm:$0x80] %vm4406_vm6, %v5324_v28 }
 0x97f   :  { %v5326_v29 = vpop.eup %5325 }
 0x980   :  { %4409 = vst.msk [vmem:[%s5721_s6 + $0x1] sm:$0x1] %vm4408_vm7, %v5326_v29 }

</bundles_post_ra>
